<compile_context>
chip_gen: v5e
topology: v5e:2x2
jax: 0.10.0
libtpu: 0.0.40
codegen_flags: <defaults>
</compile_context>

<pallas_src>
import jax
import jax.numpy as jnp
from jax.experimental import pallas as pl
from jax.experimental.pallas import tpu as pltpu


def _fwa_shift_kernel(noise_ref, w_ref, b_ref, x_ref, o_ref):
    # noise_ref: (B, Cin)   resident across grid
    # w_ref:     (Cin, C)   resident
    # b_ref:     (1, C)     resident
    # x_ref/o_ref: (B, C, tHW) lane-dense spatial tile
    shift = jnp.dot(noise_ref[...], w_ref[...],
                    preferred_element_type=jnp.float32) + b_ref[...]   # (B, C)
    out = x_ref[...].astype(jnp.float32) + shift[:, :, None]
    o_ref[...] = out.astype(o_ref.dtype)


def _fwa_affine_kernel(noise_ref, wg_ref, bg_ref, wb_ref, bb_ref, x_ref, o_ref):
    noise = noise_ref[...]                                             # (B, Cin)
    gamma = jnp.dot(noise, wg_ref[...],
                    preferred_element_type=jnp.float32) + bg_ref[...]  # (B, C)
    beta = jnp.dot(noise, wb_ref[...],
                   preferred_element_type=jnp.float32) + bb_ref[...]   # (B, C)
    scale = 1.0 + gamma
    # fused multiply-add; per-(b, c) scalars broadcast over the lane axis
    out = x_ref[...].astype(jnp.float32) * scale[:, :, None] + beta[:, :, None]
    o_ref[...] = out.astype(o_ref.dtype)


def feature_wise_affine(x, noise_embed, weight, bias, use_affine_level=False,
                        target_block_bytes=2 << 20):
    """x: (B, C, H, W); noise_embed: (B, Cin).
    weight/bias follow PyTorch Linear convention: weight (Cout, Cin), bias (Cout,)
    with Cout = C * (1 + use_affine_level). Returns (B, C, H, W)."""
    B, C, H, W = x.shape
    Cin = noise_embed.shape[1]
    HW = H * W
    itemsize = jnp.dtype(x.dtype).itemsize

    x_flat = x.reshape(B, C, HW)

    # Spatial tile: ~target_block_bytes per x block, multiple of 128 lanes.
    bytes_per_col = max(B * C * itemsize, 1)
    thw = max(128, (target_block_bytes // bytes_per_col) // 128 * 128)
    if HW % 128 == 0:
        thw = min(thw, HW)
    elif HW <= thw:
        # Ragged spatial axis that fits in one block: take the full axis
        # (block dim == full array dim is always legal, stores stay unmasked).
        thw = HW
    # else: keep 128-multiple tiles; Pallas masks the ragged boundary block.
    grid = (pl.cdiv(HW, thw),)

    x_spec = pl.BlockSpec((B, C, thw), lambda h: (0, 0, h))

    def resident(shape):
        return pl.BlockSpec(shape, lambda h: (0, 0))

    cout = int(weight.shape[0])
    cost = pl.CostEstimate(
        flops=grid[0] * 2 * B * Cin * cout + 3 * B * C * HW,
        transcendentals=0,
        bytes_accessed=2 * B * C * HW * itemsize
        + B * Cin * 4 + (cout * Cin + cout) * 4,
    )
    cparams = pltpu.CompilerParams(dimension_semantics=("parallel",))

    if use_affine_level:
        assert weight.shape == (2 * C, Cin)
        wg = weight[:C].T.astype(jnp.float32)        # (Cin, C)
        wb = weight[C:].T.astype(jnp.float32)        # (Cin, C)
        bg = bias[:C].reshape(1, C).astype(jnp.float32)
        bb = bias[C:].reshape(1, C).astype(jnp.float32)
        out = pl.pallas_call(
            _fwa_affine_kernel,
            out_shape=jax.ShapeDtypeStruct((B, C, HW), x.dtype),
            grid_spec=pltpu.PrefetchScalarGridSpec(
                num_scalar_prefetch=0,
                grid=grid,
                in_specs=[
                    resident((B, Cin)),
                    resident((Cin, C)),
                    resident((1, C)),
                    resident((Cin, C)),
                    resident((1, C)),
                    x_spec,
                ],
                out_specs=x_spec,
            ),
            compiler_params=cparams,
            cost_estimate=cost,
        )(noise_embed.astype(jnp.float32), wg, bg, wb, bb, x_flat)
    else:
        assert weight.shape == (C, Cin)
        wt = weight.T.astype(jnp.float32)            # (Cin, C)
        b2 = bias.reshape(1, C).astype(jnp.float32)
        out = pl.pallas_call(
            _fwa_shift_kernel,
            out_shape=jax.ShapeDtypeStruct((B, C, HW), x.dtype),
            grid_spec=pltpu.PrefetchScalarGridSpec(
                num_scalar_prefetch=0,
                grid=grid,
                in_specs=[
                    resident((B, Cin)),
                    resident((Cin, C)),
                    resident((1, C)),
                    x_spec,
                ],
                out_specs=x_spec,
            ),
            compiler_params=cparams,
            cost_estimate=cost,
        )(noise_embed.astype(jnp.float32), wt, b2, x_flat)

    return out.reshape(B, C, H, W)


if __name__ == "__main__":
    # Small shapes consistent with the module.
    B, C, H, W = 2, 8, 16, 16
    Cin = 32   # noise embedding dim (in_channels of the Linear)

    key = jax.random.PRNGKey(0)
    kx, kn, kw1, kb1, kw2, kb2 = jax.random.split(key, 6)

    x = jax.random.normal(kx, (B, C, H, W), dtype=jnp.float32)
    noise_embed = jax.random.normal(kn, (B, Cin), dtype=jnp.float32)

    # use_affine_level=False: Linear(Cin -> C)
    w_shift = 0.1 * jax.random.normal(kw1, (C, Cin), dtype=jnp.float32)
    b_shift = 0.1 * jax.random.normal(kb1, (C,), dtype=jnp.float32)

    # use_affine_level=True: Linear(Cin -> 2C), chunk into gamma/beta
    w_aff = 0.1 * jax.random.normal(kw2, (2 * C, Cin), dtype=jnp.float32)
    b_aff = 0.1 * jax.random.normal(kb2, (2 * C,), dtype=jnp.float32)

    # Pure-JAX references.
    ref_shift = x + (noise_embed @ w_shift.T + b_shift).reshape(B, C, 1, 1)
    y_aff = noise_embed @ w_aff.T + b_aff
    gamma = y_aff[:, :C].reshape(B, C, 1, 1)
    beta = y_aff[:, C:].reshape(B, C, 1, 1)
    ref_aff = (1.0 + gamma) * x + beta

    out_shift = feature_wise_affine(x, noise_embed, w_shift, b_shift,
                                    use_affine_level=False)
    out_shift = jax.block_until_ready(out_shift)
    assert out_shift.shape == (B, C, H, W)
    assert jnp.allclose(out_shift, ref_shift, atol=1e-5, rtol=1e-5), \
        "mismatch vs reference (shift path)"

    out_aff = feature_wise_affine(x, noise_embed, w_aff, b_aff,
                                  use_affine_level=True)
    out_aff = jax.block_until_ready(out_aff)
    assert out_aff.shape == (B, C, H, W)
    assert jnp.allclose(out_aff, ref_aff, atol=1e-5, rtol=1e-5), \
        "mismatch vs reference (affine path)"

    print("KERNEL_OK")
</pallas_src>

<mosaic_0001>
module attributes {stable_mosaic.version = 11 : i64} {
  func.func @_fwa_shift_kernel(%arg0: i32, %arg1: memref<2x32xf32, #tpu.memory_space<vmem>>, %arg2: memref<32x8xf32, #tpu.memory_space<vmem>>, %arg3: memref<1x8xf32, #tpu.memory_space<vmem>>, %arg4: memref<2x8x256xf32, #tpu.memory_space<vmem>>, %arg5: memref<2x8x256xf32, #tpu.memory_space<vmem>>) attributes {dimension_semantics = [#tpu.dimension_semantics<parallel>], iteration_bounds = array<i64: 1>, scalar_prefetch = 0 : i64, scratch_operands = 0 : i64, tpu.core_type = #tpu.core_type<tc>, window_params = [{pipeline_mode = #tpu.pipeline_mode<synchronous>, transform_indices = @transform_0, window_bounds = array<i64: 2, 32>}, {pipeline_mode = #tpu.pipeline_mode<synchronous>, transform_indices = @transform_1, window_bounds = array<i64: 32, 8>}, {pipeline_mode = #tpu.pipeline_mode<synchronous>, transform_indices = @transform_2, window_bounds = array<i64: 1, 8>}, {transform_indices = @transform_3, window_bounds = array<i64: 2, 8, 256>}, {transform_indices = @transform_4, window_bounds = array<i64: 2, 8, 256>}]} {
    %c0 = arith.constant 0 : index
    %c0_0 = arith.constant 0 : index
    %0 = vector.load %arg1[%c0, %c0_0] : memref<2x32xf32, #tpu.memory_space<vmem>>, vector<2x32xf32>
    %c0_1 = arith.constant 0 : index
    %c0_2 = arith.constant 0 : index
    %1 = vector.load %arg2[%c0_1, %c0_2] : memref<32x8xf32, #tpu.memory_space<vmem>>, vector<32x8xf32>
    %cst = arith.constant dense<0.000000e+00> : vector<2x8xf32>
    %2 = tpu.matmul %0, %1, %cst {dimension_numbers = #tpu.dot_dimension_numbers<[1], [0], [0], [1], [0, 0, 1, 1], [], []>} : vector<2x32xf32>, vector<32x8xf32>, vector<2x8xf32> -> vector<2x8xf32>
    %c0_3 = arith.constant 0 : index
    %c0_4 = arith.constant 0 : index
    %3 = vector.load %arg3[%c0_3, %c0_4] : memref<1x8xf32, #tpu.memory_space<vmem>>, vector<1x8xf32>
    %4 = vector.broadcast %3 : vector<1x8xf32> to vector<2x8xf32>
    %5 = arith.addf %2, %4 : vector<2x8xf32>
    %c0_5 = arith.constant 0 : index
    %c0_6 = arith.constant 0 : index
    %c0_7 = arith.constant 0 : index
    %6 = vector.load %arg4[%c0_5, %c0_6, %c0_7] : memref<2x8x256xf32, #tpu.memory_space<vmem>>, vector<2x8x256xf32>
    %7 = vector.shape_cast %5 : vector<2x8xf32> to vector<2x8x1xf32>
    %8 = vector.broadcast %7 : vector<2x8x1xf32> to vector<2x8x256xf32>
    %9 = arith.addf %6, %8 : vector<2x8x256xf32>
    %c0_8 = arith.constant 0 : index
    %c0_9 = arith.constant 0 : index
    %c0_10 = arith.constant 0 : index
    %10 = vector.load %arg5[%c0_8, %c0_9, %c0_10] : memref<2x8x256xf32, #tpu.memory_space<vmem>>, vector<2x8x256xf32>
    tpu.vector_store %arg5[%c0_8, %c0_9, %c0_10], %9 {strides = array<i32>} : memref<2x8x256xf32, #tpu.memory_space<vmem>>, vector<2x8x256xf32>,
    return
  }
  func.func @transform_0(%arg0: i32) -> (i32, i32) {
    %c0_i32 = arith.constant 0 : i32
    %c0_i32_0 = arith.constant 0 : i32
    %c0_i32_1 = arith.constant 0 : i32
    return %c0_i32, %c0_i32_0 : i32, i32
  }
  func.func @transform_1(%arg0: i32) -> (i32, i32) {
    %c0_i32 = arith.constant 0 : i32
    %c0_i32_0 = arith.constant 0 : i32
    %c0_i32_1 = arith.constant 0 : i32
    return %c0_i32, %c0_i32_0 : i32, i32
  }
  func.func @transform_2(%arg0: i32) -> (i32, i32) {
    %c0_i32 = arith.constant 0 : i32
    %c0_i32_0 = arith.constant 0 : i32
    %c0_i32_1 = arith.constant 0 : i32
    return %c0_i32, %c0_i32_0 : i32, i32
  }
  func.func @transform_3(%arg0: i32) -> (i32, i32, i32) {
    %c0_i32 = arith.constant 0 : i32
    %c0_i32_0 = arith.constant 0 : i32
    %c0_i32_1 = arith.constant 0 : i32
    return %c0_i32, %c0_i32_0, %arg0 : i32, i32, i32
  }
  func.func @transform_4(%arg0: i32) -> (i32, i32, i32) {
    %c0_i32 = arith.constant 0 : i32
    %c0_i32_0 = arith.constant 0 : i32
    %c0_i32_1 = arith.constant 0 : i32
    return %c0_i32, %c0_i32_0, %arg0 : i32, i32, i32
  }
}

</mosaic_0001>

<bundles_post_ra>
// kernel: tpu_custom_call.1
= control target key start
LH: loop header
LB: loop body
LE: loop exit
PB: predicated region body
PF: predicated region fallthrough
CT: control target
= control target key end

     0   :  { %v56_v2 = vlaneseq  ;;  %s188_s0 = inlined_call_operand.vmem [shape: f32[2,32], index: 0, kind: input, shape index: {}]   ;;  %s189_s1 = inlined_call_operand.vmem [shape: f32[32,8], index: 1, kind: input, shape index: {}]   ;;  %s190_s2 = inlined_call_operand.vmem [shape: f32[1,8], index: 2, kind: input, shape index: {}]   ;;  %s191_s3 = inlined_call_operand.vmem [shape: f32[2,8,256], index: 3, kind: input, shape index: {}]   ;;  %s192_s4 = inlined_call_operand.hbm [shape: f32[2,8,256], index: 4, kind: output, shape index: {}]  }
   0x1   :  { %v22_v0 = vld [vmem:[%s189_s1 + $0x18] sm:$0xff]  ;;  %v21_v1 = vld [vmem:[%s189_s1 + $0x10] sm:$0xff]  ;;  %v20_v3 = vld [vmem:[%s189_s1 + $0x8] sm:$0xff] }
   0x2   :  { %43 = vmatpush.msra.mxu0 %v22_v0  ;;  %v57_v4 = vshrl.u32 %v56_v2, 7 }
   0x3   :  { %9 = vsyncpa [#allocation3], 0  ;;  %v19_v5 = vld [vmem:[%s189_s1] sm:$0xff]  ;;  %vm27_vm0 = vcmask 261120   ;;  %v52_v13 = vld [vmem:[%s191_s3 + $0x8] sm:$0xff]  ;;  %s127_s6 = smov [#allocation2]  }
   0x4   :  { %44 = vmatpush.msra.mxu0 %v21_v1  ;;  %99 = vset.pattern.permute.xlu0 %v57_v4  ;;  %v18_v6 = vld [vmem:[%s188_s0] sm:$0x3]  ;;  %v53_v17 = vld [vmem:[%s191_s3 + $0x10] sm:$0xff]  ;;  %v54_v18 = vld [vmem:[%s191_s3 + $0x18] sm:$0xff]  ;;  %s81_s7 = sshll.u32 %s127_s6, 4  ;;  %s83_s10 = sshll.u32 %s192_s4, 4  ;;  %s82_s7 = int_to_ptr.vmem [resolvable:$true] %s81_s7  ;;  %s84_s10 = int_to_ptr.hbm [resolvable:$true] %s83_s10 }
   0x5   :  { %v100_v7 = vld [vmem:[%s190_s2] ss:$0 sm:$0xff]  ;;  %s128_s11 = smov 256   ;;  %s129_s12 = smov 16  }
   0x6   :  { %45 = vmatpush.msra.mxu0 %v20_v3  ;;  %v51_v12 = vld [vmem:[%s191_s3] sm:$0xff] }
   0x8   :  { %46 = vmatpush.msra.mxu0 %v19_v5 }
   0x9   :  { %95 = vmatmul.msk.f32.vlgmr.msra.gmra.mxu0 %vm27_vm0, %v18_v6 }
  0x86   :  { %v48_v8 = vpop.f32.mrf.mxu0 }
  0x87   :  { %v49_v9 = vadd.f32 %v100_v7, %v48_v8 }
  0x89   :  { %v55_v10 = vperm.slane %v49_v9, 0  ;;  %v62_v11 = vperm.slane %v49_v9, 1 }
  0x8b   :  { %60 = vperm.xlu0 %99, %v55_v10  }
  0x93   :  { %67 = vperm.xlu0 %99, %v62_v11  }
  0xfd   :  { %v61_v14 = vpop.permute.xlu0 %60 }
  0xfe   :  { %v69_v15 = vadd.f32 %v61_v14, %v51_v12  ;;  %v70_v16 = vadd.f32 %v61_v14, %v52_v13 }
 0x100   :  { %73 = vst [vmem:[#allocation2] sm:$0xff] %v69_v15 }
 0x101   :  { %74 = vst [vmem:[#allocation2 + $0x8] sm:$0xff] %v70_v16 }
 0x105   :  { %v68_v19 = vpop.permute.xlu0 %67 }
 0x106   :  { %v71_v20 = vadd.f32 %v68_v19, %v53_v17  ;;  %v72_v21 = vadd.f32 %v68_v19, %v54_v18 }
 0x108   :  { %75 = vst [vmem:[#allocation2 + $0x10] sm:$0xff] %v71_v20 }
 0x109   :  { %76 = vst [vmem:[#allocation2 + $0x18] sm:$0xff] %v72_v21 }
 0x10a   :  { %89 = dma.vmem_to_hbm [thread:$0]  %s82_s7, 512, %s84_s10, [#allocation3], %s128_s11, %s128_s11, %s129_s12  }
 0x10b   :  { %125 = dma.done.wait [#allocation3], 512  }
 0x10c   :  { %126 = vsyncadd [#allocation3], 4294966784 }
 0x10d   :  { %94 = vsyncpa [#allocation3], 1 }

</bundles_post_ra>
